<compile_context>
chip_gen: v6e
topology: v6e:2x2x1
jax: 0.10.0
libtpu: 0.0.40
codegen_flags: <defaults>
</compile_context>

<pallas_src>
import jax
import jax.numpy as jnp
from jax.experimental import pallas as pl
from jax.experimental.pallas import tpu as pltpu

# ---------------- model sizes (small, consistent with the module) -----------
NUM_GRAPHS = 4                       # graphs in the batch
NODES_PER_GRAPH = 32
N_NODES = NUM_GRAPHS * NODES_PER_GRAPH   # 128 nodes -> fills the 128-lane axis
F_IN = 16                            # GCNConv(-1, n_1) infers this from x
N_1 = 32
N_2 = 16
E_PER_GRAPH = 64
G_PAD = 8                            # pooled rows padded to a full sublane tile
OUT_LANES = 128                      # lane-dense output slab

# ---------------- packed-parameter layout: (PACK_ROWS, N_1) f32 --------------
ROW_W1 = 0                           # rows [0, F_IN)        : w1  (F_IN, N_1)
ROW_W2 = F_IN                        # rows [F_IN, F_IN+N_1) : w2  (N_1, N_2) zero-padded to N_1 cols
ROW_B1 = F_IN + N_1                  # 48 : b1  (N_1,)
ROW_B2 = ROW_B1 + 1                  # 49 : b2  (N_2,) zero-padded
ROW_WFC = ROW_B1 + 2                 # 50 : fc weight (N_2,) zero-padded
ROW_BFC = ROW_B1 + 3                 # 51 : fc bias in column 0
PACK_ROWS = 56                       # rounded up to a multiple of 8 sublanes


# ---------------------------------------------------------------------------
# Fused forward kernel: conv1 -> relu -> conv2 -> mean-pool -> fc
# Single invocation (no grid); everything is VMEM-resident.
# ---------------------------------------------------------------------------
def gcn_forward_kernel(adj_ref, x_ref, p_ref, batch_ref, out_ref):
    # bf16 MXU operands, f32 accumulation (review: v6e/v7x native bf16 path;
    # also fine on v5e's MXU).
    adj = adj_ref[...].astype(jnp.bfloat16)                 # (N, N)  D^-1/2 (A+I) D^-1/2
    x = x_ref[...].astype(jnp.bfloat16)                     # (N, F_IN)

    w1 = p_ref[ROW_W1:ROW_W1 + F_IN, :].astype(jnp.bfloat16)      # (F_IN, N_1)
    w2 = p_ref[ROW_W2:ROW_W2 + N_1, :].astype(jnp.bfloat16)       # (N_1, N_1), cols >= N_2 are 0
    b1 = p_ref[ROW_B1:ROW_B1 + 1, :]                              # (1, N_1)  f32
    b2 = p_ref[ROW_B2:ROW_B2 + 1, :]                              # (1, N_1)  f32 (zero-padded)
    wfc = p_ref[ROW_WFC:ROW_WFC + 1, :]                           # (1, N_1)  f32 (zero-padded)
    bfc = p_ref[ROW_BFC:ROW_BFC + 1, :][:, 0:1]                   # (1, 1)    f32

    # conv1: relu( Â @ (X @ W1) + b1 )
    h = jnp.dot(x, w1, preferred_element_type=jnp.float32)                        # (N, N_1)
    h = jnp.dot(adj, h.astype(jnp.bfloat16), preferred_element_type=jnp.float32) + b1
    h = jnp.maximum(h, 0.0)

    # conv2: Â @ (H @ W2) + b2   (padding columns stay exactly zero)
    h = jnp.dot(h.astype(jnp.bfloat16), w2, preferred_element_type=jnp.float32)   # (N, N_1)
    h = jnp.dot(adj, h.astype(jnp.bfloat16), preferred_element_type=jnp.float32) + b2

    # global_mean_pool: build the (G_PAD, N) one-hot of `batch` in-kernel.
    g_ids = jax.lax.broadcasted_iota(jnp.int32, (G_PAD, N_NODES), 0)
    onehot = (g_ids == batch_ref[...]).astype(jnp.float32)                         # (G_PAD, N)
    counts = jnp.sum(onehot, axis=1, keepdims=True)                                # (G_PAD, 1)
    pooled = jnp.dot(onehot.astype(jnp.bfloat16), h.astype(jnp.bfloat16),
                     preferred_element_type=jnp.float32)                            # (G_PAD, N_1)
    pooled = pooled / jnp.maximum(counts, 1.0)

    # Dropout(p=0.25) is identity at inference.

    # fc: Linear(n_2, 1) as a lane reduction; zero-padded wfc keeps extra cols inert.
    y = jnp.sum(pooled * wfc, axis=-1, keepdims=True) + bfc                         # (G_PAD, 1)

    # Lane-dense output slab (unmasked stores); wrapper slices [:G, :1].
    out_ref[...] = jnp.broadcast_to(y, (G_PAD, OUT_LANES))


# ---------------------------------------------------------------------------
# Wrapper-side graph preprocessing (plain JAX, scatter-free, fused under jit)
# ---------------------------------------------------------------------------
def build_norm_adj(edge_index, num_nodes):
    """PyG GCNConv default: add self-loops + symmetric normalization.

    Built with a one-hot matmul (no TPU scatter).  Duplicate edges sum, matching
    torch_geometric semantics.
    """
    src, dst = edge_index[0], edge_index[1]
    node_ids = jnp.arange(num_nodes, dtype=edge_index.dtype)
    dst_oh = (dst[:, None] == node_ids[None, :]).astype(jnp.float32)   # (E, N)
    src_oh = (src[:, None] == node_ids[None, :]).astype(jnp.float32)   # (E, N)
    a = dst_oh.T @ src_oh                                              # A[i, j] = #edges j->i
    a = a + jnp.eye(num_nodes, dtype=jnp.float32)                      # self-loops
    deg = jnp.sum(a, axis=1)                                           # in-degree incl. self-loop
    dinv = jax.lax.rsqrt(jnp.maximum(deg, 1e-12))
    return a * dinv[:, None] * dinv[None, :]


def pack_params(params):
    w1, b1, w2, b2, wfc, bfc = params
    p = jnp.zeros((PACK_ROWS, N_1), jnp.float32)
    p = p.at[ROW_W1:ROW_W1 + F_IN, :].set(w1)
    p = p.at[ROW_W2:ROW_W2 + N_1, 0:N_2].set(w2)
    p = p.at[ROW_B1, :].set(b1.reshape(N_1))
    p = p.at[ROW_B2, 0:N_2].set(b2.reshape(N_2))
    p = p.at[ROW_WFC, 0:N_2].set(wfc.reshape(N_2))
    p = p.at[ROW_BFC, 0].set(bfc.reshape(()))
    return p


@jax.jit
def net_forward(x, edge_index, batch, params):
    n = x.shape[0]
    adj = build_norm_adj(edge_index, n)
    p = pack_params(params)
    batch2d = batch.reshape(1, n).astype(jnp.int32)
    out = pl.pallas_call(
        gcn_forward_kernel,
        out_shape=jax.ShapeDtypeStruct((G_PAD, OUT_LANES), jnp.float32),
        in_specs=[pl.BlockSpec(memory_space=pltpu.MemorySpace.VMEM)] * 4,
        out_specs=pl.BlockSpec(memory_space=pltpu.MemorySpace.VMEM),
    )(adj, x, p, batch2d)
    return out[:NUM_GRAPHS, :1]


@jax.jit
def net_forward_ref(x, edge_index, batch, params):
    """Pure-JAX (f32, HIGHEST precision) reference of the same forward pass."""
    adj = build_norm_adj(edge_index, x.shape[0])
    w1, b1, w2, b2, wfc, bfc = params
    hp = jax.lax.Precision.HIGHEST
    h = jnp.dot(x, w1, precision=hp)
    h = jnp.maximum(jnp.dot(adj, h, precision=hp) + b1, 0.0)
    h = jnp.dot(h, w2, precision=hp)
    h = jnp.dot(adj, h, precision=hp) + b2
    onehot = (batch[None, :] == jnp.arange(NUM_GRAPHS, dtype=jnp.int32)[:, None])
    onehot = onehot.astype(jnp.float32)
    counts = jnp.maximum(jnp.sum(onehot, axis=1, keepdims=True), 1.0)
    pooled = jnp.dot(onehot, h, precision=hp) / counts
    return jnp.dot(pooled, wfc.T, precision=hp) + bfc


# ---------------------------------------------------------------------------
# Secondary kernel: quadratic-weighted Cohen kappa (lane-dense, pure VPU).
# Divide-by-zero guard added per review.  If this runs in the same step as the
# forward, it could be folded into the same pallas_call; kept separate here.
# ---------------------------------------------------------------------------
KAPPA_N = 256
KAPPA_C = 4
KAPPA_LANES = 128
KAPPA_ROWS = KAPPA_N // KAPPA_LANES      # 2 -> two full vregs of labels


def kappa_kernel(t_ref, o_ref, k_ref):
    t = t_ref[...].astype(jnp.float32)   # (R, 128) lane-dense labels
    o = o_ref[...].astype(jnp.float32)
    d = t - o
    num = jnp.sum(d * d)                 # == sum(W * confusion)
    s1_t = jnp.sum(t)
    s1_o = jnp.sum(o)
    s2 = jnp.sum(t * t) + jnp.sum(o * o)
    n = jnp.float32(KAPPA_N)
    den = (n * s2 - 2.0 * s1_t * s1_o) / n   # == sum(W * expected)
    den_safe = jnp.where(den > 0.0, den, 1.0)
    k = jnp.where(den > 0.0, 1.0 - num / den_safe, 1.0)   # perfect agreement -> 1.0
    k_ref[...] = jnp.broadcast_to(k, (1, 1)).astype(jnp.float32)


@jax.jit
def kappa_loss(output, target):
    o2 = output.astype(jnp.int32).reshape(KAPPA_ROWS, KAPPA_LANES)
    t2 = target.astype(jnp.int32).reshape(KAPPA_ROWS, KAPPA_LANES)
    res = pl.pallas_call(
        kappa_kernel,
        out_shape=jax.ShapeDtypeStruct((1, 1), jnp.float32),
        in_specs=[pl.BlockSpec(memory_space=pltpu.MemorySpace.VMEM)] * 2,
        out_specs=pl.BlockSpec(memory_space=pltpu.MemorySpace.VMEM),
    )(t2, o2)
    return res[0, 0]


def kappa_ref(output, target):
    """sklearn.cohen_kappa_score(weights='quadratic') mirror (confusion-matrix form)."""
    oh_t = jax.nn.one_hot(target, KAPPA_C, dtype=jnp.float32)
    oh_o = jax.nn.one_hot(output, KAPPA_C, dtype=jnp.float32)
    confusion = oh_t.T @ oh_o
    idx = jnp.arange(KAPPA_C, dtype=jnp.float32)
    w = (idx[:, None] - idx[None, :]) ** 2
    expected = jnp.outer(confusion.sum(axis=1), confusion.sum(axis=0)) / KAPPA_N
    return 1.0 - jnp.sum(w * confusion) / jnp.sum(w * expected)


if __name__ == "__main__":
    key = jax.random.PRNGKey(0)
    ks = jax.random.split(key, 12)

    # ----- graph batch inputs (data.x, data.edge_index, data.batch) -----
    x = jax.random.normal(ks[0], (N_NODES, F_IN), jnp.float32)
    src = jax.random.randint(ks[1], (NUM_GRAPHS, E_PER_GRAPH), 0, NODES_PER_GRAPH, jnp.int32)
    dst = jax.random.randint(ks[2], (NUM_GRAPHS, E_PER_GRAPH), 0, NODES_PER_GRAPH, jnp.int32)
    offs = (jnp.arange(NUM_GRAPHS, dtype=jnp.int32) * NODES_PER_GRAPH)[:, None]
    edge_index = jnp.stack([(src + offs).reshape(-1),
                            (dst + offs).reshape(-1)]).astype(jnp.int32)
    batch = jnp.repeat(jnp.arange(NUM_GRAPHS, dtype=jnp.int32), NODES_PER_GRAPH)

    # ----- parameters -----
    w1 = jax.random.normal(ks[3], (F_IN, N_1), jnp.float32) * 0.1
    b1 = jax.random.normal(ks[4], (1, N_1), jnp.float32) * 0.1
    w2 = jax.random.normal(ks[5], (N_1, N_2), jnp.float32) * 0.1
    b2 = jax.random.normal(ks[6], (1, N_2), jnp.float32) * 0.1
    wfc = jax.random.normal(ks[7], (1, N_2), jnp.float32) * 0.1     # Linear(n_2, 1).weight
    bfc = jax.random.normal(ks[8], (1, 1), jnp.float32) * 0.1
    params = (w1, b1, w2, b2, wfc, bfc)

    # ----- run fused GCN forward kernel and check against reference -----
    y_pallas = jax.block_until_ready(net_forward(x, edge_index, batch, params))
    y_ref = jax.block_until_ready(net_forward_ref(x, edge_index, batch, params))
    assert y_pallas.shape == (NUM_GRAPHS, 1)
    assert jnp.allclose(y_pallas, y_ref, rtol=1e-2, atol=1e-2), (y_pallas, y_ref)

    # ----- run kappa kernel and check against sklearn-style reference -----
    tgt = jax.random.randint(ks[9], (KAPPA_N,), 0, KAPPA_C, dtype=jnp.int32)
    noise = jax.random.randint(ks[10], (KAPPA_N,), -1, 2, dtype=jnp.int32)
    out_lbl = jnp.clip(tgt + noise, 0, KAPPA_C - 1).astype(jnp.int32)
    k_pallas = jax.block_until_ready(kappa_loss(out_lbl, tgt))
    k_expect = jax.block_until_ready(kappa_ref(out_lbl, tgt))
    assert jnp.allclose(k_pallas, k_expect, atol=1e-5), (k_pallas, k_expect)

    print("KERNEL_OK")
</pallas_src>

<mosaic_0001>
module attributes {stable_mosaic.version = 11 : i64} {
  func.func @gcn_forward_kernel(%arg0: memref<128x128xf32, #tpu.memory_space<vmem>>, %arg1: memref<128x16xf32, #tpu.memory_space<vmem>>, %arg2: memref<56x32xf32, #tpu.memory_space<vmem>>, %arg3: memref<1x128xi32, #tpu.memory_space<vmem>>, %arg4: memref<8x128xf32, #tpu.memory_space<vmem>>) attributes {dimension_semantics = [], scalar_prefetch = 0 : i64, scratch_operands = 0 : i64, tpu.core_type = #tpu.core_type<tc>} {
    %c0 = arith.constant 0 : index
    %c0_0 = arith.constant 0 : index
    %0 = vector.load %arg0[%c0, %c0_0] : memref<128x128xf32, #tpu.memory_space<vmem>>, vector<128x128xf32>
    %1 = arith.truncf %0 : vector<128x128xf32> to vector<128x128xbf16>
    %c0_1 = arith.constant 0 : index
    %c0_2 = arith.constant 0 : index
    %2 = vector.load %arg1[%c0_1, %c0_2] : memref<128x16xf32, #tpu.memory_space<vmem>>, vector<128x16xf32>
    %3 = arith.truncf %2 : vector<128x16xf32> to vector<128x16xbf16>
    %c0_3 = arith.constant 0 : index
    %c0_4 = arith.constant 0 : index
    %4 = vector.load %arg2[%c0_3, %c0_4] : memref<56x32xf32, #tpu.memory_space<vmem>>, vector<16x32xf32>
    %5 = arith.truncf %4 : vector<16x32xf32> to vector<16x32xbf16>
    %c16 = arith.constant 16 : index
    %c0_5 = arith.constant 0 : index
    %6 = vector.load %arg2[%c16, %c0_5] : memref<56x32xf32, #tpu.memory_space<vmem>>, vector<32x32xf32>
    %7 = arith.truncf %6 : vector<32x32xf32> to vector<32x32xbf16>
    %c48 = arith.constant 48 : index
    %c0_6 = arith.constant 0 : index
    %8 = vector.load %arg2[%c48, %c0_6] : memref<56x32xf32, #tpu.memory_space<vmem>>, vector<1x32xf32>
    %c49 = arith.constant 49 : index
    %c0_7 = arith.constant 0 : index
    %9 = vector.load %arg2[%c49, %c0_7] : memref<56x32xf32, #tpu.memory_space<vmem>>, vector<1x32xf32>
    %c50 = arith.constant 50 : index
    %c0_8 = arith.constant 0 : index
    %10 = vector.load %arg2[%c50, %c0_8] : memref<56x32xf32, #tpu.memory_space<vmem>>, vector<1x32xf32>
    %c51 = arith.constant 51 : index
    %c0_9 = arith.constant 0 : index
    %11 = vector.load %arg2[%c51, %c0_9] : memref<56x32xf32, #tpu.memory_space<vmem>>, vector<1x32xf32>
    %12 = vector.extract_strided_slice %11 {offsets = [0, 0], sizes = [1, 1], strides = [1, 1]} : vector<1x32xf32> to vector<1x1xf32>
    %cst = arith.constant dense<0.000000e+00> : vector<128x32xf32>
    %13 = tpu.matmul %3, %5, %cst {dimension_numbers = #tpu.dot_dimension_numbers<[1], [0], [0], [1], [0, 0, 1, 1], [], []>} : vector<128x16xbf16>, vector<16x32xbf16>, vector<128x32xf32> -> vector<128x32xf32>
    %14 = arith.truncf %13 : vector<128x32xf32> to vector<128x32xbf16>
    %cst_10 = arith.constant dense<0.000000e+00> : vector<128x32xf32>
    %15 = tpu.matmul %1, %14, %cst_10 {dimension_numbers = #tpu.dot_dimension_numbers<[1], [0], [0], [1], [0, 0, 1, 1], [], []>} : vector<128x128xbf16>, vector<128x32xbf16>, vector<128x32xf32> -> vector<128x32xf32>
    %16 = vector.broadcast %8 : vector<1x32xf32> to vector<128x32xf32>
    %17 = arith.addf %15, %16 : vector<128x32xf32>
    %cst_11 = arith.constant 0.000000e+00 : f32
    %18 = vector.broadcast %cst_11 : f32 to vector<128x32xf32>
    %19 = arith.maximumf %17, %18 : vector<128x32xf32>
    %20 = arith.truncf %19 : vector<128x32xf32> to vector<128x32xbf16>
    %cst_12 = arith.constant dense<0.000000e+00> : vector<128x32xf32>
    %21 = tpu.matmul %20, %7, %cst_12 {dimension_numbers = #tpu.dot_dimension_numbers<[1], [0], [0], [1], [0, 0, 1, 1], [], []>} : vector<128x32xbf16>, vector<32x32xbf16>, vector<128x32xf32> -> vector<128x32xf32>
    %22 = arith.truncf %21 : vector<128x32xf32> to vector<128x32xbf16>
    %cst_13 = arith.constant dense<0.000000e+00> : vector<128x32xf32>
    %23 = tpu.matmul %1, %22, %cst_13 {dimension_numbers = #tpu.dot_dimension_numbers<[1], [0], [0], [1], [0, 0, 1, 1], [], []>} : vector<128x128xbf16>, vector<128x32xbf16>, vector<128x32xf32> -> vector<128x32xf32>
    %24 = vector.broadcast %9 : vector<1x32xf32> to vector<128x32xf32>
    %25 = arith.addf %23, %24 : vector<128x32xf32>
    %26 = tpu.iota {dimensions = array<i32: 0>} : vector<8x128xi32>
    %c0_14 = arith.constant 0 : index
    %c0_15 = arith.constant 0 : index
    %27 = vector.load %arg3[%c0_14, %c0_15] : memref<1x128xi32, #tpu.memory_space<vmem>>, vector<1x128xi32>
    %28 = vector.broadcast %27 : vector<1x128xi32> to vector<8x128xi32>
    %29 = arith.cmpi eq, %26, %28 : vector<8x128xi32>
    %30 = arith.extui %29 : vector<8x128xi1> to vector<8x128xi32>
    %31 = arith.sitofp %30 : vector<8x128xi32> to vector<8x128xf32>
    %cst_16 = arith.constant dense<0.000000e+00> : vector<8xf32>
    %32 = vector.multi_reduction <add>, %31, %cst_16 [1] : vector<8x128xf32> to vector<8xf32>
    %33 = vector.shape_cast %32 : vector<8xf32> to vector<8x1xf32>
    %34 = arith.truncf %31 : vector<8x128xf32> to vector<8x128xbf16>
    %35 = arith.truncf %25 : vector<128x32xf32> to vector<128x32xbf16>
    %cst_17 = arith.constant dense<0.000000e+00> : vector<8x32xf32>
    %36 = tpu.matmul %34, %35, %cst_17 {dimension_numbers = #tpu.dot_dimension_numbers<[1], [0], [0], [1], [0, 0, 1, 1], [], []>} : vector<8x128xbf16>, vector<128x32xbf16>, vector<8x32xf32> -> vector<8x32xf32>
    %cst_18 = arith.constant 1.000000e+00 : f32
    %37 = vector.broadcast %cst_18 : f32 to vector<8x1xf32>
    %38 = arith.maximumf %33, %37 : vector<8x1xf32>
    %39 = vector.broadcast %38 : vector<8x1xf32> to vector<8x32xf32>
    %40 = arith.divf %36, %39 : vector<8x32xf32>
    %41 = vector.broadcast %10 : vector<1x32xf32> to vector<8x32xf32>
    %42 = arith.mulf %40, %41 : vector<8x32xf32>
    %cst_19 = arith.constant dense<0.000000e+00> : vector<8xf32>
    %43 = vector.multi_reduction <add>, %42, %cst_19 [1] : vector<8x32xf32> to vector<8xf32>
    %44 = vector.shape_cast %43 : vector<8xf32> to vector<8x1xf32>
    %45 = vector.broadcast %12 : vector<1x1xf32> to vector<8x1xf32>
    %46 = arith.addf %44, %45 : vector<8x1xf32>
    %47 = vector.shape_cast %46 : vector<8x1xf32> to vector<8x1xf32>
    %48 = vector.broadcast %47 : vector<8x1xf32> to vector<8x128xf32>
    %c0_20 = arith.constant 0 : index
    %c0_21 = arith.constant 0 : index
    %49 = vector.load %arg4[%c0_20, %c0_21] : memref<8x128xf32, #tpu.memory_space<vmem>>, vector<8x128xf32>
    tpu.vector_store %arg4[%c0_20, %c0_21], %48 {strides = array<i32>} : memref<8x128xf32, #tpu.memory_space<vmem>>, vector<8x128xf32>,
    return
  }
}

</mosaic_0001>

<bundles_post_ra>
// kernel: net_forward.1
= control target key start
LH: loop header
LB: loop body
LE: loop exit
PB: predicated region body
PF: predicated region fallthrough
CT: control target
= control target key end

     0   :  { %vm79_vm0 = vcmask 130048   ;;  %vm334_vm1 = vcmask 261120   ;;  %vm867_vm2 = vmmov 0   ;;  %s1094_s2 = inlined_call_operand.vmem [shape: f32[56,32], index: 2, kind: input, shape index: {}]   ;;  %s1095_s1 = inlined_call_operand.vmem [shape: f32[128,16], index: 1, kind: input, shape index: {}]   ;;  %s1096_s0 = inlined_call_operand.vmem [shape: f32[128,128], index: 0, kind: input, shape index: {}]   ;;  %s1097_s3 = inlined_call_operand.vmem [shape: s32[1,128], index: 3, kind: input, shape index: {}]   ;;  %s1098_s4 = inlined_call_operand.vmem [shape: f32[8,128], index: 4, kind: output, shape index: {}]  }
   0x1   :  { %v66_v0 = vld [vmem:[%s1094_s2] sm:$0xff]  ;;  %v67_v1 = vld [vmem:[%s1094_s2 + $0x8] sm:$0xff]  ;;  %v44_v6 = vld [vmem:[%s1095_s1 + $0x10] sm:$0xff] }
   0x2   :  { %v68_v2 = vpack.c.bf16 %v67_v1, %v66_v0  ;;  %v42_v3 = vld [vmem:[%s1095_s1] sm:$0xff]  ;;  %v43_v4 = vld [vmem:[%s1095_s1 + $0x8] sm:$0xff]  ;;  %v45_v7 = vld [vmem:[%s1095_s1 + $0x18] sm:$0xff] }
   0x3   :  { %v58_v5 = vpack.c.bf16 %v43_v4, %v42_v3  ;;  %v46_v8 = vld [vmem:[%s1095_s1 + $0x20] sm:$0xff]  ;;  %v59_v9 = vpack.c.bf16 %v45_v7, %v44_v6  ;;  %v47_v10 = vld [vmem:[%s1095_s1 + $0x28] sm:$0xff]  ;;  %v48_v12 = vld [vmem:[%s1095_s1 + $0x30] sm:$0xff] }
   0x4   :  { %736 = vmatprep.subr.bf16.mxu0 %v68_v2  ;;  %v60_v11 = vpack.c.bf16 %v47_v10, %v46_v8  ;;  %v49_v13 = vld [vmem:[%s1095_s1 + $0x38] sm:$0xff]  ;;  %v50_v14 = vld [vmem:[%s1095_s1 + $0x40] sm:$0xff]  ;;  %v51_v15 = vld [vmem:[%s1095_s1 + $0x48] sm:$0xff] }
   0x5   :  { %737 = vmatpush3.bf16.msra.mxu0 %v68_v2  ;;  %738 = vmatprep.mubr.msk.bf16.mxu0 %vm79_vm0, %v58_v5  ;;  %v61_v16 = vpack.c.bf16 %v49_v13, %v48_v12  ;;  %v62_v17 = vpack.c.bf16 %v51_v15, %v50_v14  ;;  %v52_v18 = vld [vmem:[%s1095_s1 + $0x50] sm:$0xff]  ;;  %v53_v19 = vld [vmem:[%s1095_s1 + $0x58] sm:$0xff]  ;;  %v54_v20 = vld [vmem:[%s1095_s1 + $0x60] sm:$0xff] }
   0x6   :  { %v55_v21 = vld [vmem:[%s1095_s1 + $0x68] sm:$0xff]  ;;  %v63_v22 = vpack.c.bf16 %v53_v19, %v52_v18  ;;  %v56_v24 = vld [vmem:[%s1095_s1 + $0x70] sm:$0xff]  ;;  %v57_v25 = vld [vmem:[%s1095_s1 + $0x78] sm:$0xff] }
   0x7   :  { %v64_v23 = vpack.c.bf16 %v55_v21, %v54_v20  ;;  %v65_v26 = vpack.c.bf16 %v57_v25, %v56_v24  ;;  %v18_v27 = vld [vmem:[%s1096_s0] sm:$0xff]  ;;  %v19_v28 = vld [vmem:[%s1096_s0 + $0x8] sm:$0xff]  ;;  %v69_v32 = vld [vmem:[%s1094_s2 + $0x10] sm:$0xff] }
   0x8   :  { %739 = vmatmul.mubr.msk.bf16.vlgmr.msra.gmra.mxu0 %vm79_vm0, %v59_v9  ;;  %v963_v29 = vpack.c.bf16 %v19_v28, %v18_v27  ;;  %v71_v30 = vld [vmem:[%s1094_s2 + $0x20] sm:$0xff]  ;;  %v72_v31 = vld [vmem:[%s1094_s2 + $0x28] sm:$0xff]  ;;  %v70_v34 = vld [vmem:[%s1094_s2 + $0x18] sm:$0xff] }
   0x9   :  { %742 = vmatprep.mubr.msk.bf16.mxu0 %vm79_vm0, %v60_v11  ;;  %v74_v33 = vpack.c.bf16 %v72_v31, %v71_v30  ;;  %v73_v35 = vpack.c.bf16 %v70_v34, %v69_v32  ;;  %v20_v60 = vld [vmem:[%s1096_s0 + $0x10] sm:$0xff]  ;;  %v21_v61 = vld [vmem:[%s1096_s0 + $0x18] sm:$0xff]  ;;  %v22_v62 = vld [vmem:[%s1096_s0 + $0x20] sm:$0xff] }
   0xa   :  { %770 = vmatprep.mubr.bf16.mxu1 %v963_v29  ;;  %v23_v63 = vld [vmem:[%s1096_s0 + $0x28] sm:$0xff]  ;;  %v990_v0 = vpack.c.bf16 %v21_v61, %v20_v60  ;;  %v24_v2 = vld [vmem:[%s1096_s0 + $0x30] sm:$0xff]  ;;  %v25_v3 = vld [vmem:[%s1096_s0 + $0x38] sm:$0xff] }
   0xb   :  { %786 = vmatprep.subr.bf16.mxu0 %v74_v33  ;;  %v992_v1 = vpack.c.bf16 %v23_v63, %v22_v62  ;;  %v26_v4 = vld [vmem:[%s1096_s0 + $0x40] sm:$0xff]  ;;  %v27_v5 = vld [vmem:[%s1096_s0 + $0x48] sm:$0xff]  ;;  %v1008_v6 = vpack.c.bf16 %v25_v3, %v24_v2  ;;  %v28_v8 = vld [vmem:[%s1096_s0 + $0x50] sm:$0xff] }
   0xc   :  { %787 = vmatpush3.bf16.msra.mxu0 %v74_v33  ;;  %v1010_v7 = vpack.c.bf16 %v27_v5, %v26_v4  ;;  %v29_v9 = vld [vmem:[%s1096_s0 + $0x58] sm:$0xff]  ;;  %v30_v10 = vld [vmem:[%s1096_s0 + $0x60] sm:$0xff]  ;;  %v31_v11 = vld [vmem:[%s1096_s0 + $0x68] sm:$0xff] }
   0xd   :  { %788 = vmatprep.subr.bf16.mxu0 %v73_v35  ;;  %v1026_v12 = vpack.c.bf16 %v29_v9, %v28_v8  ;;  %v1028_v13 = vpack.c.bf16 %v31_v11, %v30_v10  ;;  %v32_v14 = vld [vmem:[%s1096_s0 + $0x70] sm:$0xff]  ;;  %v33_v15 = vld [vmem:[%s1096_s0 + $0x78] sm:$0xff] }
   0xe   :  { %v660_v19 = vld [vmem:[%s1094_s2 + $0x30] ss:$0 sm:$0xff] }
  0x10   :  { %743 = vmatmul.mubr.msk.bf16.gmra.mxu0 %vm79_vm0, %v61_v16  ;;  %v1038_v16 = vpack.c.bf16 %v33_v15, %v32_v14 }
  0x11   :  { %746 = vmatprep.mubr.msk.bf16.mxu0 %vm79_vm0, %v62_v17  ;;  %789 = vmatpush3.bf16.msra.mxu0 %v73_v35 }
  0x18   :  { %747 = vmatmul.mubr.msk.bf16.gmra.mxu0 %vm79_vm0, %v63_v22 }
  0x19   :  { %750 = vmatprep.mubr.msk.bf16.mxu0 %vm79_vm0, %v64_v23 }
  0x20   :  { %751 = vmatmul.mubr.msk.bf16.gmra.mxu0 %vm79_vm0, %v65_v26 }
  0xc8   :  { %v740_v36 = vpop.f32.mrf.mxu0 }
  0xca   :  { %v138_v37 = vpop.f32.mrf.mxu0 }
  0xcc   :  { %v741_v38 = vpop.f32.mrf.mxu0 }
  0xcd   :  { %v202_v58 = vpack.c.bf16 %v741_v38, %v740_v36 }
  0xce   :  { %v141_v39 = vpop.f32.mrf.mxu0 }
  0xcf   :  { %v201_v59 = vpack.c.bf16 %v141_v39, %v138_v37 }
  0xd0   :  { %v744_v40 = vpop.f32.mrf.mxu0 }
  0xd2   :  { %v154_v41 = vpop.f32.mrf.mxu0 }
  0xd4   :  { %v745_v42 = vpop.f32.mrf.mxu0 }
  0xd5   :  { %v204_v56 = vpack.c.bf16 %v745_v42, %v744_v40 }
  0xd6   :  { %v157_v43 = vpop.f32.mrf.mxu0 }
  0xd7   :  { %v203_v57 = vpack.c.bf16 %v157_v43, %v154_v41 }
  0xd8   :  { %v748_v44 = vpop.f32.mrf.mxu0 }
  0xda   :  { %v170_v45 = vpop.f32.mrf.mxu0 }
  0xdc   :  { %v749_v46 = vpop.f32.mrf.mxu0 }
  0xdd   :  { %v206_v54 = vpack.c.bf16 %v749_v46, %v748_v44 }
  0xde   :  { %v173_v47 = vpop.f32.mrf.mxu0 }
  0xdf   :  { %v205_v55 = vpack.c.bf16 %v173_v47, %v170_v45 }
  0xe0   :  { %v752_v48 = vpop.f32.mrf.mxu0 }
  0xe2   :  { %v186_v49 = vpop.f32.mrf.mxu0 }
  0xe4   :  { %v753_v50 = vpop.f32.mrf.mxu0 }
  0xe5   :  { %v208_v51 = vpack.c.bf16 %v753_v50, %v752_v48 }
  0xe6   :  { %v189_v52 = vpop.f32.mrf.mxu0 }
  0xe7   :  { %v207_v53 = vpack.c.bf16 %v189_v52, %v186_v49  ;;  %754 = vmatprep.subr.bf16.mxu1 %v208_v51 }
  0xe8   :  { %755 = vmatpush3.bf16.msra.mxu1 %v208_v51 }
  0xe9   :  { %756 = vmatprep.subr.bf16.mxu1 %v207_v53 }
  0xec   :  { %757 = vmatpush3.bf16.msra.mxu1 %v207_v53 }
  0xed   :  { %758 = vmatprep.subr.bf16.mxu1 %v206_v54 }
  0xf0   :  { %759 = vmatpush3.bf16.msra.mxu1 %v206_v54 }
  0xf1   :  { %760 = vmatprep.subr.bf16.mxu1 %v205_v55 }
  0xf4   :  { %761 = vmatpush3.bf16.msra.mxu1 %v205_v55 }
  0xf5   :  { %762 = vmatprep.subr.bf16.mxu1 %v204_v56 }
  0xf8   :  { %763 = vmatpush3.bf16.msra.mxu1 %v204_v56 }
  0xf9   :  { %764 = vmatprep.subr.bf16.mxu1 %v203_v57 }
  0xfc   :  { %765 = vmatpush3.bf16.msra.mxu1 %v203_v57 }
  0xfd   :  { %766 = vmatprep.subr.bf16.mxu1 %v202_v58 }
 0x100   :  { %767 = vmatpush3.bf16.msra.mxu1 %v202_v58 }
 0x101   :  { %768 = vmatprep.subr.bf16.mxu1 %v201_v59 }
 0x104   :  { %769 = vmatpush3.bf16.msra.mxu1 %v201_v59 }
 0x107   :  { %771 = vmatmul.mubr.bf16.vlgmr.msra.gmra.mxu1 %v990_v0 }
 0x108   :  { %774 = vmatprep.mubr.bf16.mxu1 %v992_v1 }
 0x10f   :  { %775 = vmatmul.mubr.bf16.gmra.mxu1 %v1008_v6 }
 0x110   :  { %778 = vmatprep.mubr.bf16.mxu1 %v1010_v7 }
 0x117   :  { %779 = vmatmul.mubr.bf16.gmra.mxu1 %v1026_v12 }
 0x118   :  { %782 = vmatprep.mubr.bf16.mxu1 %v1028_v13 }
 0x11f   :  { %783 = vmatmul.mubr.bf16.gmra.mxu1 %v1038_v16 }
 0x120   :  { %822 = vmatprep.mubr.bf16.mxu1 %v963_v29 }
 0x1c7   :  { %v772_v17 = vpop.f32.mrf.mxu1 }
 0x1c8   :  { %v256_v23 = vadd.f32 %v772_v17, %v660_v19 }
 0x1c9   :  { %v247_v18 = vpop.f32.mrf.mxu1 }
 0x1ca   :  { %v248_v21 = vadd.f32 %v660_v19, %v247_v18  ;;  %v312_v31 = vmax.f32 %v256_v23, 0.0 }
 0x1cb   :  { %v773_v20 = vpop.f32.mrf.mxu1 }
 0x1cc   :  { %v259_v22 = vadd.f32 %v773_v20, %v660_v19  ;;  %v310_v28 = vmax.f32 %v248_v21, 0.0 }
 0x1cd   :  { %v250_v24 = vpop.f32.mrf.mxu1 }
 0x1ce   :  { %v251_v25 = vadd.f32 %v660_v19, %v250_v24  ;;  %v313_v26 = vmax.f32 %v259_v22, 0.0 }
 0x1cf   :  { %v776_v27 = vpop.f32.mrf.mxu1 }
 0x1d0   :  { %v311_v30 = vmax.f32 %v251_v25, 0.0  ;;  %v327_v33 = vpack.c.bf16 %v313_v26, %v312_v31  ;;  %v272_v37 = vadd.f32 %v776_v27, %v660_v19 }
 0x1d1   :  { %v263_v32 = vpop.f32.mrf.mxu1 }
 0x1d2   :  { %v326_v29 = vpack.c.bf16 %v311_v30, %v310_v28  ;;  %v264_v35 = vadd.f32 %v660_v19, %v263_v32  ;;  %v316_v44 = vmax.f32 %v272_v37, 0.0 }
 0x1d3   :  { %v777_v34 = vpop.f32.mrf.mxu1 }
 0x1d4   :  { %v275_v36 = vadd.f32 %v777_v34, %v660_v19  ;;  %790 = vmatprep.mubr.msk.bf16.mxu0 %vm334_vm1, %v326_v29  ;;  %v314_v42 = vmax.f32 %v264_v35, 0.0 }
 0x1d5   :  { %v266_v38 = vpop.f32.mrf.mxu1  ;;  %791 = vmatmul.mubr.msk.bf16.vlgmr.msra.gmra.mxu0 %vm334_vm1, %v327_v33 }
 0x1d6   :  { %v267_v39 = vadd.f32 %v660_v19, %v266_v38  ;;  %v317_v40 = vmax.f32 %v275_v36, 0.0 }
 0x1d7   :  { %v780_v41 = vpop.f32.mrf.mxu1 }
 0x1d8   :  { %v315_v43 = vmax.f32 %v267_v39, 0.0  ;;  %v329_v47 = vpack.c.bf16 %v317_v40, %v316_v44  ;;  %v288_v51 = vadd.f32 %v780_v41, %v660_v19  ;;  %v866_v41 = vmov 0.0  }
 0x1d9   :  { %v279_v45 = vpop.f32.mrf.mxu1  ;;  %838 = vmatprep.subr.bf16.mxu0 %v866_v41 }
 0x1da   :  { %v328_v46 = vpack.c.bf16 %v315_v43, %v314_v42  ;;  %v280_v49 = vadd.f32 %v660_v19, %v279_v45  ;;  %v320_v58 = vmax.f32 %v288_v51, 0.0  ;;  %v565_v42 = vlaneseq }
 0x1db   :  { %v781_v48 = vpop.f32.mrf.mxu1 }
 0x1dc   :  { %v291_v50 = vadd.f32 %v781_v48, %v660_v19  ;;  %794 = vmatprep.mubr.msk.bf16.mxu0 %vm334_vm1, %v328_v46  ;;  %v318_v56 = vmax.f32 %v280_v49, 0.0  ;;  %v1061_v43 = vshrl.u32 %v565_v42, 7 }
 0x1dd   :  { %v282_v52 = vpop.f32.mrf.mxu1  ;;  %795 = vmatmul.mubr.msk.bf16.gmra.mxu0 %vm334_vm1, %v329_v47 }
 0x1de   :  { %v283_v53 = vadd.f32 %v660_v19, %v282_v52  ;;  %v321_v54 = vmax.f32 %v291_v50, 0.0 }
 0x1df   :  { %v784_v55 = vpop.f32.mrf.mxu1 }
 0x1e0   :  { %v319_v57 = vmax.f32 %v283_v53, 0.0  ;;  %v331_v61 = vpack.c.bf16 %v321_v54, %v320_v58  ;;  %v304_v3 = vadd.f32 %v784_v55, %v660_v19  ;;  %v669_v53 = vld [vmem:[%s1094_s2 + $0x31] ss:$0 sm:$0xff] }
 0x1e1   :  { %v295_v59 = vpop.f32.mrf.mxu1 }
 0x1e2   :  { %v330_v60 = vpack.c.bf16 %v319_v57, %v318_v56  ;;  %v296_v63 = vadd.f32 %v660_v19, %v295_v59  ;;  %v324_v11 = vmax.f32 %v304_v3, 0.0 }
 0x1e3   :  { %v785_v62 = vpop.f32.mrf.mxu1 }
 0x1e4   :  { %v307_v2 = vadd.f32 %v785_v62, %v660_v19  ;;  %798 = vmatprep.mubr.msk.bf16.mxu0 %vm334_vm1, %v330_v60  ;;  %v322_v9 = vmax.f32 %v296_v63, 0.0 }
 0x1e5   :  { %v298_v4 = vpop.f32.mrf.mxu1  ;;  %799 = vmatmul.mubr.msk.bf16.gmra.mxu0 %vm334_vm1, %v331_v61 }
 0x1e6   :  { %v299_v5 = vadd.f32 %v660_v19, %v298_v4  ;;  %v325_v8 = vmax.f32 %v307_v2, 0.0 }
 0x1e8   :  { %v323_v10 = vmax.f32 %v299_v5, 0.0  ;;  %v333_v15 = vpack.c.bf16 %v325_v8, %v324_v11 }
 0x1ea   :  { %v332_v14 = vpack.c.bf16 %v323_v10, %v322_v9 }
 0x1ec   :  { %802 = vmatprep.mubr.msk.bf16.mxu0 %vm334_vm1, %v332_v14 }
 0x1ed   :  { %803 = vmatmul.mubr.msk.bf16.gmra.mxu0 %vm334_vm1, %v333_v15 }
 0x1ee   :  { %854 = vmatprep.mubr.msk.bf16.mxu0 %vm867_vm2, %v866_v41 }
 0x295   :  { %v792_v17 = vpop.f32.mrf.mxu0 }
 0x297   :  { %v393_v18 = vpop.f32.mrf.mxu0 }
 0x299   :  { %v793_v20 = vpop.f32.mrf.mxu0 }
 0x29a   :  { %v457_v39 = vpack.c.bf16 %v793_v20, %v792_v17 }
 0x29b   :  { %v396_v21 = vpop.f32.mrf.mxu0 }
 0x29c   :  { %v456_v40 = vpack.c.bf16 %v396_v21, %v393_v18 }
 0x29d   :  { %v796_v22 = vpop.f32.mrf.mxu0 }
 0x29f   :  { %v409_v23 = vpop.f32.mrf.mxu0 }
 0x2a1   :  { %v797_v24 = vpop.f32.mrf.mxu0 }
 0x2a2   :  { %v459_v37 = vpack.c.bf16 %v797_v24, %v796_v22  ;;  %v868_v24 = vmov 1.0|1.0  }
 0x2a3   :  { %v412_v25 = vpop.f32.mrf.mxu0 }
 0x2a4   :  { %v458_v38 = vpack.c.bf16 %v412_v25, %v409_v23 }
 0x2a5   :  { %v800_v26 = vpop.f32.mrf.mxu0 }
 0x2a7   :  { %v425_v19 = vpop.f32.mrf.mxu0 }
 0x2a9   :  { %v801_v27 = vpop.f32.mrf.mxu0 }
 0x2aa   :  { %v461_v35 = vpack.c.bf16 %v801_v27, %v800_v26 }
 0x2ab   :  { %v428_v28 = vpop.f32.mrf.mxu0 }
 0x2ac   :  { %v460_v36 = vpack.c.bf16 %v428_v28, %v425_v19  ;;  %v674_v28 = vld [vmem:[%s1094_s2 + $0x32] ss:$0 sm:$0xff] }
 0x2ad   :  { %v804_v30 = vpop.f32.mrf.mxu0 }
 0x2af   :  { %v441_v31 = vpop.f32.mrf.mxu0 }
 0x2b1   :  { %v805_v32 = vpop.f32.mrf.mxu0 }
 0x2b2   :  { %v463_v29 = vpack.c.bf16 %v805_v32, %v804_v30 }
 0x2b3   :  { %v444_v33 = vpop.f32.mrf.mxu0 }
 0x2b4   :  { %v462_v34 = vpack.c.bf16 %v444_v33, %v441_v31  ;;  %806 = vmatprep.subr.bf16.mxu1 %v463_v29 }
 0x2b5   :  { %807 = vmatpush3.bf16.msra.mxu1 %v463_v29 }
 0x2b6   :  { %808 = vmatprep.subr.bf16.mxu1 %v462_v34 }
 0x2b9   :  { %809 = vmatpush3.bf16.msra.mxu1 %v462_v34 }
 0x2ba   :  { %810 = vmatprep.subr.bf16.mxu1 %v461_v35 }
 0x2bd   :  { %811 = vmatpush3.bf16.msra.mxu1 %v461_v35  ;;  %v869_v35 = vmov 0  }
 0x2be   :  { %812 = vmatprep.subr.bf16.mxu1 %v460_v36  ;;  %862 = vset.pattern.permute.xlu1 %v869_v35 }
 0x2bf   :  { %863 = vset.pattern.permute.xlu0 %v869_v35 }
 0x2c1   :  { %813 = vmatpush3.bf16.msra.mxu1 %v460_v36  ;;  %v675_v36 = vld [vmem:[%s1094_s2 + $0x33] ss:$0 sm:$0xff] }
 0x2c2   :  { %814 = vmatprep.subr.bf16.mxu1 %v459_v37 }
 0x2c5   :  { %815 = vmatpush3.bf16.msra.mxu1 %v459_v37 }
 0x2c6   :  { %816 = vmatprep.subr.bf16.mxu1 %v458_v38 }
 0x2c9   :  { %817 = vmatpush3.bf16.msra.mxu1 %v458_v38 }
 0x2ca   :  { %818 = vmatprep.subr.bf16.mxu1 %v457_v39 }
 0x2cd   :  { %819 = vmatpush3.bf16.msra.mxu1 %v457_v39 }
 0x2ce   :  { %820 = vmatprep.subr.bf16.mxu1 %v456_v40 }
 0x2d1   :  { %821 = vmatpush3.bf16.msra.mxu1 %v456_v40 }
 0x2d4   :  { %823 = vmatmul.mubr.bf16.vlgmr.msra.gmra.mxu1 %v990_v0  ;;  %v670_v0 = vld [vmem:[%s1097_s3] ss:$0 sm:$0xff] }
 0x2d5   :  { %826 = vmatprep.mubr.bf16.mxu1 %v992_v1  ;;  %vm572_vm3 = vcmp.eq.s32.totalorder %v1061_v43, %v670_v0 }
 0x2d6   :  { %v671_v1 = vsel %vm572_vm3, 1.0, %v866_v41  ;;  %vm672_vm4 = vmpackc.low %vm572_vm3, %vm572_vm3 }
 0x2d7   :  { %575 = vadd.xlane.f32.xlu0 %v671_v1 }
 0x2dc   :  { %827 = vmatmul.mubr.bf16.gmra.mxu1 %v1008_v6 }
 0x2dd   :  { %830 = vmatprep.mubr.bf16.mxu1 %v1010_v7 }
 0x2e4   :  { %831 = vmatmul.mubr.bf16.gmra.mxu1 %v1026_v12 }
 0x2e5   :  { %834 = vmatprep.mubr.bf16.mxu1 %v1028_v13 }
 0x2ec   :  { %835 = vmatmul.mubr.bf16.gmra.mxu1 %v1038_v16 }
 0x360   :  { %v576_v25 = vpop.xlane.xlu0 %575 }
 0x361   :  { %v626_v26 = vmax.f32 %v576_v25, 1.0 }
 0x363   :  { %864 = vrcp.f32 %v626_v26 }
 0x370   :  { %v865_v19 = vpop.eup %864 }
 0x394   :  { %v824_v6 = vpop.f32.mrf.mxu1 }
 0x395   :  { %v511_v18 = vadd.f32 %v824_v6, %v669_v53 }
 0x396   :  { %v502_v7 = vpop.f32.mrf.mxu1 }
 0x397   :  { %v503_v22 = vadd.f32 %v669_v53, %v502_v7 }
 0x398   :  { %v825_v12 = vpop.f32.mrf.mxu1 }
 0x399   :  { %v514_v15 = vadd.f32 %v825_v12, %v669_v53 }
 0x39a   :  { %v505_v13 = vpop.f32.mrf.mxu1 }
 0x39b   :  { %v579_v20 = vpack.c.bf16 %v514_v15, %v511_v18  ;;  %v506_v21 = vadd.f32 %v669_v53, %v505_v13 }
 0x39c   :  { %v828_v16 = vpop.f32.mrf.mxu1 }
 0x39d   :  { %v527_v9 = vadd.f32 %v828_v16, %v669_v53  ;;  %v578_v23 = vpack.c.bf16 %v506_v21, %v503_v22 }
 0x39e   :  { %v518_v44 = vpop.f32.mrf.mxu1 }
 0x39f   :  { %v519_v14 = vadd.f32 %v669_v53, %v518_v44 }
 0x3a0   :  { %v829_v45 = vpop.f32.mrf.mxu1 }
 0x3a1   :  { %v530_v5 = vadd.f32 %v829_v45, %v669_v53 }
 0x3a2   :  { %v521_v46 = vpop.f32.mrf.mxu1 }
 0x3a3   :  { %v581_v10 = vpack.c.bf16 %v530_v5, %v527_v9  ;;  %v522_v11 = vadd.f32 %v669_v53, %v521_v46 }
 0x3a4   :  { %v832_v47 = vpop.f32.mrf.mxu1 }
 0x3a5   :  { %v543_v63 = vadd.f32 %v832_v47, %v669_v53  ;;  %v580_v17 = vpack.c.bf16 %v522_v11, %v519_v14 }
 0x3a6   :  { %v534_v48 = vpop.f32.mrf.mxu1 }
 0x3a7   :  { %v535_v4 = vadd.f32 %v669_v53, %v534_v48 }
 0x3a8   :  { %v833_v49 = vpop.f32.mrf.mxu1 }
 0x3a9   :  { %v546_v61 = vadd.f32 %v833_v49, %v669_v53 }
 0x3aa   :  { %v537_v50 = vpop.f32.mrf.mxu1 }
 0x3ab   :  { %v583_v2 = vpack.c.bf16 %v546_v61, %v543_v63  ;;  %v538_v3 = vadd.f32 %v669_v53, %v537_v50 }
 0x3ac   :  { %v836_v51 = vpop.f32.mrf.mxu1 }
 0x3ad   :  { %v559_v55 = vadd.f32 %v836_v51, %v669_v53  ;;  %v582_v8 = vpack.c.bf16 %v538_v3, %v535_v4 }
 0x3ae   :  { %v550_v52 = vpop.f32.mrf.mxu1 }
 0x3af   :  { %v551_v60 = vadd.f32 %v669_v53, %v550_v52 }
 0x3b0   :  { %v837_v54 = vpop.f32.mrf.mxu1 }
 0x3b1   :  { %v562_v56 = vadd.f32 %v837_v54, %v669_v53 }
 0x3b2   :  { %v553_v57 = vpop.f32.mrf.mxu1 }
 0x3b3   :  { %v585_v58 = vpack.c.bf16 %v562_v56, %v559_v55  ;;  %v554_v59 = vadd.f32 %v669_v53, %v553_v57 }
 0x3b5   :  { %839 = vmatpush3.bf16.msra.mxu0 %v585_v58  ;;  %v584_v62 = vpack.c.bf16 %v554_v59, %v551_v60 }
 0x3b6   :  { %840 = vmatprep.subr.bf16.mxu0 %v866_v41 }
 0x3b9   :  { %841 = vmatpush3.bf16.msra.mxu0 %v584_v62 }
 0x3ba   :  { %842 = vmatprep.subr.bf16.mxu0 %v866_v41 }
 0x3bd   :  { %843 = vmatpush3.bf16.msra.mxu0 %v583_v2 }
 0x3be   :  { %844 = vmatprep.subr.bf16.mxu0 %v866_v41 }
 0x3c1   :  { %845 = vmatpush3.bf16.msra.mxu0 %v582_v8 }
 0x3c2   :  { %846 = vmatprep.subr.bf16.mxu0 %v866_v41 }
 0x3c5   :  { %847 = vmatpush3.bf16.msra.mxu0 %v581_v10 }
 0x3c6   :  { %848 = vmatprep.subr.bf16.mxu0 %v866_v41 }
 0x3c9   :  { %849 = vmatpush3.bf16.msra.mxu0 %v580_v17 }
 0x3ca   :  { %850 = vmatprep.subr.bf16.mxu0 %v866_v41 }
 0x3cd   :  { %851 = vmatpush3.bf16.msra.mxu0 %v579_v20 }
 0x3ce   :  { %852 = vmatprep.subr.bf16.mxu0 %v866_v41 }
 0x3d1   :  { %853 = vmatpush3.bf16.msra.mxu0 %v578_v23 }
 0x3d4   :  { %855 = vmatmul.mubr.msk.bf16.vlgmr.msra.gmra.mxu0 %vm672_vm4, %v868_v24 }
 0x494   :  { %v620_v27 = vpop.f32.mrf.mxu0 }
 0x495   :  { %v628_v30 = vmul.f32 %v865_v19, %v620_v27 }
 0x496   :  { %v856_v31 = vpop.f32.mrf.mxu0 }
 0x497   :  { %v633_v32 = vmul.f32 %v674_v28, %v628_v30 }
 0x498   :  { %v623_v29 = vpop.f32.mrf.mxu0 }
 0x499   :  { %v634_v33 = vsel %vm334_vm1, %v633_v32, 0.0 }
 0x49a   :  { %v857_v34 = vpop.f32.mrf.mxu0  ;;  %635 = vadd.xlane.f32.xlu0 %v634_v33 }
 0x523   :  { %v636_v37 = vpop.xlane.xlu0 %635 }
 0x524   :  { %v641_v38 = vadd.f32 %v675_v36, %v636_v37 }
 0x526   :  { %644 = vperm.xlu1 %862, %v641_v38  }
 0x5a1   :  { %v645_v39 = vpop.permute.xlu1 %644 }
 0x5a2   :  { %647 = vst [vmem:[%s1098_s4] sm:$0xff] %v645_v39 }

</bundles_post_ra>
